<compile_context>
chip_gen: v7x
topology: tpu7x:2x2x1
jax: 0.10.0
libtpu: 0.0.40
codegen_flags: <defaults>
</compile_context>

<pallas_src>
import functools

import jax
import jax.numpy as jnp
from jax.experimental import pallas as pl
from jax.experimental.pallas import tpu as pltpu

_LANE = 128
_SUBLANE = 8


def _round_up(x, m):
    return (x + m - 1) // m * m


def _mlp_deep_kernel(x_ref, w1_ref, b1_ref, w2_ref, b2_ref, w3_ref, b3_ref,
                     y_ref, h2_ref):
    """One batch tile: (TB, Din) -> relu -> (TB, Hp) -> relu -> (TB, Op), fully fused.

    Matmul operands are in the compute dtype (bf16); accumulation and the
    bias + ReLU epilogue are fp32.
    """
    cd = w1_ref.dtype
    x = x_ref[...]
    h1 = jnp.dot(x, w1_ref[...], preferred_element_type=jnp.float32) + b1_ref[...]
    h1 = jnp.maximum(h1, 0.0)
    h2 = jnp.dot(h1.astype(cd), w2_ref[...], preferred_element_type=jnp.float32) + b2_ref[...]
    h2 = jnp.maximum(h2, 0.0)
    y = jnp.dot(h2.astype(cd), w3_ref[...], preferred_element_type=jnp.float32) + b3_ref[...]
    y_ref[...] = y.astype(y_ref.dtype)
    h2_ref[...] = h2.astype(h2_ref.dtype)


@functools.partial(jax.jit, static_argnames=("block_rows", "compute_dtype"))
def mlp_deep_forward(x, params, *, block_rows=256, compute_dtype=jnp.bfloat16):
    """Returns (y_pred, h_2), matching the PyTorch module's forward."""
    w1, b1, w2, b2, w3, b3 = params
    B, Din = x.shape
    H = w1.shape[1]
    O = w3.shape[1]

    # Lane-dense padded feature dims (removes masked vst.msk partial stores).
    Hp = _round_up(H, _LANE)
    Op = _round_up(O, _LANE)

    # Batch tile: multiple of 8 sublanes, capped so double-buffered tiles fit the
    # default scoped-VMEM limit on every generation (v5e 16 MiB .. v7x 32 MiB).
    TB = _round_up(min(block_rows, _round_up(B, _SUBLANE)), _SUBLANE)
    Bp = _round_up(B, TB)

    cd = jnp.dtype(compute_dtype)
    # Zero-pad weights / biases to lane-dense shapes. Padded hidden columns give
    # relu(0 + 0) == 0 exactly, so the valid output region is identical to unpadded math.
    w1p = jnp.zeros((Din, Hp), cd).at[:, :H].set(w1.astype(cd))
    b1p = jnp.zeros((1, Hp), jnp.float32).at[:, :H].set(b1.reshape(1, H))
    w2p = jnp.zeros((Hp, Hp), cd).at[:H, :H].set(w2.astype(cd))
    b2p = jnp.zeros((1, Hp), jnp.float32).at[:, :H].set(b2.reshape(1, H))
    w3p = jnp.zeros((Hp, Op), cd).at[:H, :O].set(w3.astype(cd))
    b3p = jnp.zeros((1, Op), jnp.float32).at[:, :O].set(b3.reshape(1, O))

    xp = x.astype(cd)
    if Bp != B:
        xp = jnp.pad(xp, ((0, Bp - B), (0, 0)))

    resident = lambda shape: pl.BlockSpec(shape, lambda i: (0, 0))  # fetched once, stays in VMEM

    y_pad, h2_pad = pl.pallas_call(
        _mlp_deep_kernel,
        out_shape=(
            jax.ShapeDtypeStruct((Bp, Op), jnp.float32),
            jax.ShapeDtypeStruct((Bp, Hp), jnp.float32),
        ),
        grid=(Bp // TB,),
        in_specs=[
            pl.BlockSpec((TB, Din), lambda i: (i, 0)),   # x: streamed batch tiles
            resident((Din, Hp)), resident((1, Hp)),      # w1, b1
            resident((Hp, Hp)), resident((1, Hp)),       # w2, b2
            resident((Hp, Op)), resident((1, Op)),       # w3, b3
        ],
        out_specs=(
            pl.BlockSpec((TB, Op), lambda i: (i, 0)),    # y (lane-dense, 128-wide)
            pl.BlockSpec((TB, Hp), lambda i: (i, 0)),    # h2 (lane-dense, 128-wide)
        ),
        compiler_params=pltpu.CompilerParams(
            dimension_semantics=("parallel",),  # shard batch tiles across v7x's 2 TCs
        ),
    )(xp, w1p, b1p, w2p, b2p, w3p, b3p)

    return y_pad[:B, :O], h2_pad[:B, :H]


def init_params(key, input_dim, output_dim, hidden_size=64):
    """Deterministic init mimicking PyTorch nn.Linear default U(-1/sqrt(fan_in), +)."""
    def linear(key, fan_in, fan_out):
        kw, kb = jax.random.split(key)
        bound = 1.0 / jnp.sqrt(fan_in)
        # stored as (in, out) so the kernel does x @ W
        w = jax.random.uniform(kw, (fan_in, fan_out), jnp.float32, -bound, bound)
        b = jax.random.uniform(kb, (fan_out,), jnp.float32, -bound, bound)
        return w, b

    k1, k2, k3 = jax.random.split(key, 3)
    w1, b1 = linear(k1, input_dim, hidden_size)
    w2, b2 = linear(k2, hidden_size, hidden_size)
    w3, b3 = linear(k3, hidden_size, output_dim)
    return (w1, b1, w2, b2, w3, b3)


def reference_forward(x, params, compute_dtype=jnp.bfloat16):
    """Plain-JAX reference with the same mixed-precision recipe as the kernel."""
    w1, b1, w2, b2, w3, b3 = params
    cd = jnp.dtype(compute_dtype)
    h1 = jnp.maximum(
        jnp.dot(x.astype(cd), w1.astype(cd), preferred_element_type=jnp.float32) + b1, 0.0)
    h2 = jnp.maximum(
        jnp.dot(h1.astype(cd), w2.astype(cd), preferred_element_type=jnp.float32) + b2, 0.0)
    y = jnp.dot(h2.astype(cd), w3.astype(cd), preferred_element_type=jnp.float32) + b3
    return y, h2


if __name__ == "__main__":
    key = jax.random.PRNGKey(0)
    k_params, k_x1, k_x2 = jax.random.split(key, 3)

    input_dim, hidden_size, output_dim = 32, 64, 10
    params = init_params(k_params, input_dim, output_dim, hidden_size)

    def check(batch, k, block_rows):
        x = jax.random.normal(k, (batch, input_dim), jnp.float32)
        y, h2 = mlp_deep_forward(x, params, block_rows=block_rows)
        jax.block_until_ready((y, h2))
        y_ref, h2_ref = reference_forward(x, params)
        assert y.shape == (batch, output_dim), y.shape
        assert h2.shape == (batch, hidden_size), h2.shape
        assert jnp.allclose(y, y_ref, atol=1e-4, rtol=1e-4), "y_pred mismatch"
        assert jnp.allclose(h2, h2_ref, atol=1e-4, rtol=1e-4), "h_2 mismatch"

    # Tiny batch: single grid step, exercises the lane-padded 10/64-wide outputs.
    check(8, k_x1, 128)
    # Batch not a multiple of the tile: multi-step grid + batch-row padding path.
    check(300, k_x2, 128)

    print("KERNEL_OK")
</pallas_src>

<mosaic_0001>
module attributes {stable_mosaic.version = 11 : i64} {
  func.func @_mlp_deep_kernel(%arg0: i32, %arg1: memref<8x32xbf16, #tpu.memory_space<vmem>>, %arg2: memref<32x128xbf16, #tpu.memory_space<vmem>>, %arg3: memref<1x128xf32, #tpu.memory_space<vmem>>, %arg4: memref<128x128xbf16, #tpu.memory_space<vmem>>, %arg5: memref<1x128xf32, #tpu.memory_space<vmem>>, %arg6: memref<128x128xbf16, #tpu.memory_space<vmem>>, %arg7: memref<1x128xf32, #tpu.memory_space<vmem>>, %arg8: memref<8x128xf32, #tpu.memory_space<vmem>>, %arg9: memref<8x128xf32, #tpu.memory_space<vmem>>) attributes {dimension_semantics = [#tpu.dimension_semantics<parallel>], iteration_bounds = array<i64: 1>, scalar_prefetch = 0 : i64, scratch_operands = 0 : i64, tpu.core_type = #tpu.core_type<tc>, window_params = [{transform_indices = @transform_0, window_bounds = array<i64: 8, 32>}, {pipeline_mode = #tpu.pipeline_mode<synchronous>, transform_indices = @transform_1, window_bounds = array<i64: 32, 128>}, {pipeline_mode = #tpu.pipeline_mode<synchronous>, transform_indices = @transform_2, window_bounds = array<i64: 1, 128>}, {pipeline_mode = #tpu.pipeline_mode<synchronous>, transform_indices = @transform_3, window_bounds = array<i64: 128, 128>}, {pipeline_mode = #tpu.pipeline_mode<synchronous>, transform_indices = @transform_4, window_bounds = array<i64: 1, 128>}, {pipeline_mode = #tpu.pipeline_mode<synchronous>, transform_indices = @transform_5, window_bounds = array<i64: 128, 128>}, {pipeline_mode = #tpu.pipeline_mode<synchronous>, transform_indices = @transform_6, window_bounds = array<i64: 1, 128>}, {transform_indices = @transform_7, window_bounds = array<i64: 8, 128>}, {transform_indices = @transform_8, window_bounds = array<i64: 8, 128>}]} {
    %c0 = arith.constant 0 : index
    %c0_0 = arith.constant 0 : index
    %0 = vector.load %arg1[%c0, %c0_0] : memref<8x32xbf16, #tpu.memory_space<vmem>>, vector<8x32xbf16>
    %c0_1 = arith.constant 0 : index
    %c0_2 = arith.constant 0 : index
    %1 = vector.load %arg2[%c0_1, %c0_2] : memref<32x128xbf16, #tpu.memory_space<vmem>>, vector<32x128xbf16>
    %cst = arith.constant dense<0.000000e+00> : vector<8x128xf32>
    %2 = tpu.matmul %0, %1, %cst {dimension_numbers = #tpu.dot_dimension_numbers<[1], [0], [0], [1], [0, 0, 1, 1], [], []>} : vector<8x32xbf16>, vector<32x128xbf16>, vector<8x128xf32> -> vector<8x128xf32>
    %c0_3 = arith.constant 0 : index
    %c0_4 = arith.constant 0 : index
    %3 = vector.load %arg3[%c0_3, %c0_4] : memref<1x128xf32, #tpu.memory_space<vmem>>, vector<1x128xf32>
    %4 = vector.broadcast %3 : vector<1x128xf32> to vector<8x128xf32>
    %5 = arith.addf %2, %4 : vector<8x128xf32>
    %cst_5 = arith.constant 0.000000e+00 : f32
    %6 = vector.broadcast %cst_5 : f32 to vector<8x128xf32>
    %7 = arith.maximumf %5, %6 : vector<8x128xf32>
    %8 = arith.truncf %7 : vector<8x128xf32> to vector<8x128xbf16>
    %c0_6 = arith.constant 0 : index
    %c0_7 = arith.constant 0 : index
    %9 = vector.load %arg4[%c0_6, %c0_7] : memref<128x128xbf16, #tpu.memory_space<vmem>>, vector<128x128xbf16>
    %cst_8 = arith.constant dense<0.000000e+00> : vector<8x128xf32>
    %10 = tpu.matmul %8, %9, %cst_8 {dimension_numbers = #tpu.dot_dimension_numbers<[1], [0], [0], [1], [0, 0, 1, 1], [], []>} : vector<8x128xbf16>, vector<128x128xbf16>, vector<8x128xf32> -> vector<8x128xf32>
    %c0_9 = arith.constant 0 : index
    %c0_10 = arith.constant 0 : index
    %11 = vector.load %arg5[%c0_9, %c0_10] : memref<1x128xf32, #tpu.memory_space<vmem>>, vector<1x128xf32>
    %12 = vector.broadcast %11 : vector<1x128xf32> to vector<8x128xf32>
    %13 = arith.addf %10, %12 : vector<8x128xf32>
    %cst_11 = arith.constant 0.000000e+00 : f32
    %14 = vector.broadcast %cst_11 : f32 to vector<8x128xf32>
    %15 = arith.maximumf %13, %14 : vector<8x128xf32>
    %16 = arith.truncf %15 : vector<8x128xf32> to vector<8x128xbf16>
    %c0_12 = arith.constant 0 : index
    %c0_13 = arith.constant 0 : index
    %17 = vector.load %arg6[%c0_12, %c0_13] : memref<128x128xbf16, #tpu.memory_space<vmem>>, vector<128x128xbf16>
    %cst_14 = arith.constant dense<0.000000e+00> : vector<8x128xf32>
    %18 = tpu.matmul %16, %17, %cst_14 {dimension_numbers = #tpu.dot_dimension_numbers<[1], [0], [0], [1], [0, 0, 1, 1], [], []>} : vector<8x128xbf16>, vector<128x128xbf16>, vector<8x128xf32> -> vector<8x128xf32>
    %c0_15 = arith.constant 0 : index
    %c0_16 = arith.constant 0 : index
    %19 = vector.load %arg7[%c0_15, %c0_16] : memref<1x128xf32, #tpu.memory_space<vmem>>, vector<1x128xf32>
    %20 = vector.broadcast %19 : vector<1x128xf32> to vector<8x128xf32>
    %21 = arith.addf %18, %20 : vector<8x128xf32>
    %c0_17 = arith.constant 0 : index
    %c0_18 = arith.constant 0 : index
    %22 = vector.load %arg8[%c0_17, %c0_18] : memref<8x128xf32, #tpu.memory_space<vmem>>, vector<8x128xf32>
    tpu.vector_store %arg8[%c0_17, %c0_18], %21 {strides = array<i32>} : memref<8x128xf32, #tpu.memory_space<vmem>>, vector<8x128xf32>,
    %c0_19 = arith.constant 0 : index
    %c0_20 = arith.constant 0 : index
    %23 = vector.load %arg9[%c0_19, %c0_20] : memref<8x128xf32, #tpu.memory_space<vmem>>, vector<8x128xf32>
    tpu.vector_store %arg9[%c0_19, %c0_20], %15 {strides = array<i32>} : memref<8x128xf32, #tpu.memory_space<vmem>>, vector<8x128xf32>,
    return
  }
  func.func @transform_0(%arg0: i32) -> (i32, i32) {
    %c0_i32 = arith.constant 0 : i32
    %c0_i32_0 = arith.constant 0 : i32
    return %arg0, %c0_i32 : i32, i32
  }
  func.func @transform_1(%arg0: i32) -> (i32, i32) {
    %c0_i32 = arith.constant 0 : i32
    %c0_i32_0 = arith.constant 0 : i32
    %c0_i32_1 = arith.constant 0 : i32
    return %c0_i32, %c0_i32_0 : i32, i32
  }
  func.func @transform_2(%arg0: i32) -> (i32, i32) {
    %c0_i32 = arith.constant 0 : i32
    %c0_i32_0 = arith.constant 0 : i32
    %c0_i32_1 = arith.constant 0 : i32
    return %c0_i32, %c0_i32_0 : i32, i32
  }
  func.func @transform_3(%arg0: i32) -> (i32, i32) {
    %c0_i32 = arith.constant 0 : i32
    %c0_i32_0 = arith.constant 0 : i32
    %c0_i32_1 = arith.constant 0 : i32
    return %c0_i32, %c0_i32_0 : i32, i32
  }
  func.func @transform_4(%arg0: i32) -> (i32, i32) {
    %c0_i32 = arith.constant 0 : i32
    %c0_i32_0 = arith.constant 0 : i32
    %c0_i32_1 = arith.constant 0 : i32
    return %c0_i32, %c0_i32_0 : i32, i32
  }
  func.func @transform_5(%arg0: i32) -> (i32, i32) {
    %c0_i32 = arith.constant 0 : i32
    %c0_i32_0 = arith.constant 0 : i32
    %c0_i32_1 = arith.constant 0 : i32
    return %c0_i32, %c0_i32_0 : i32, i32
  }
  func.func @transform_6(%arg0: i32) -> (i32, i32) {
    %c0_i32 = arith.constant 0 : i32
    %c0_i32_0 = arith.constant 0 : i32
    %c0_i32_1 = arith.constant 0 : i32
    return %c0_i32, %c0_i32_0 : i32, i32
  }
  func.func @transform_7(%arg0: i32) -> (i32, i32) {
    %c0_i32 = arith.constant 0 : i32
    %c0_i32_0 = arith.constant 0 : i32
    return %arg0, %c0_i32 : i32, i32
  }
  func.func @transform_8(%arg0: i32) -> (i32, i32) {
    %c0_i32 = arith.constant 0 : i32
    %c0_i32_0 = arith.constant 0 : i32
    return %arg0, %c0_i32 : i32, i32
  }
}

</mosaic_0001>

<bundles_post_ra>
// kernel: mlp_deep_forward.1
= control target key start
LH: loop header
LB: loop body
LE: loop exit
PB: predicated region body
PF: predicated region fallthrough
CT: control target
= control target key end

     0   :  { %14 = vsyncpa [#allocation3], 0  ;;  %v516_v1 = vmov 0.0   ;;  %vm517_vm0 = vmmov 0   ;;  %vm55_vm1 = vcmask 261120   ;;  %s679_s0 = inlined_call_operand.vmem [shape: bf16[8,32], index: 0, kind: input, shape index: {}]   ;;  %s680_s1 = inlined_call_operand.vmem [shape: bf16[32,128], index: 1, kind: input, shape index: {}]   ;;  %s681_s2 = inlined_call_operand.vmem [shape: f32[1,128], index: 2, kind: input, shape index: {}]   ;;  %s682_s3 = inlined_call_operand.vmem [shape: bf16[128,128], index: 3, kind: input, shape index: {}]   ;;  %s683_s4 = inlined_call_operand.vmem [shape: f32[1,128], index: 4, kind: input, shape index: {}]   ;;  %s684_s5 = inlined_call_operand.vmem [shape: bf16[128,128], index: 5, kind: input, shape index: {}]   ;;  %s685_s6 = inlined_call_operand.vmem [shape: f32[1,128], index: 6, kind: input, shape index: {}]   ;;  %s686_s7 = inlined_call_operand.hbm [shape: f32[8,128], index: 7, kind: output, shape index: {0}]   ;;  %s687_s8 = inlined_call_operand.hbm [shape: f32[8,128], index: 8, kind: output, shape index: {1}]  }
   0x1   :  { %v450_v0 = vld [vmem:[%s680_s1] sm:$0xff]   ;;  %398 = vmatprep.subr.bf16.mxu0 %v516_v1  ;;  %406 = vmatprep.subr.bf16.mxu1 %v516_v1  ;;  %v451_v2 = vld [vmem:[%s680_s1 + $0x8] sm:$0xff]   ;;  %v454_v6 = vld [vmem:[%s682_s3 + $0x10] sm:$0xff]  }
   0x2   :  { %399 = vmatpush3.bf16.msra.mxu0 %v450_v0  ;;  %402 = vmatprep.mubr.msk.bf16.mxu0 %vm517_vm0, %v516_v1  ;;  %v452_v3 = vld [vmem:[%s682_s3] sm:$0xff]   ;;  %v453_v4 = vld [vmem:[%s682_s3 + $0x8] sm:$0xff]   ;;  %v455_v7 = vld [vmem:[%s682_s3 + $0x18] sm:$0xff]  }
   0x3   :  { %400 = vmatprep.subr.bf16.mxu0 %v516_v1  ;;  %422 = vmatprep.mubr.msk.bf16.mxu1 %vm517_vm0, %v516_v1  ;;  %v31_v5 = vld [vmem:[%s679_s0] sm:$0xf] }
   0x4   :  { %407 = vmatpush3.bf16.msra.mxu1 %v452_v3 }
   0x5   :  { %408 = vmatprep.subr.bf16.mxu1 %v516_v1 }
   0x6   :  { %401 = vmatpush3.bf16.msra.mxu0 %v451_v2 }
   0x7   :  { %426 = vmatprep.subr.bf16.mxu0 %v516_v1 }
   0x8   :  { %409 = vmatpush3.bf16.msra.mxu1 %v453_v4 }
   0x9   :  { %403 = vmatmul.mubr.msk.bf16.vlgmr.msra.gmra.mrb[0].mxu0 %vm55_vm1, %v31_v5  ;;  %410 = vmatprep.subr.bf16.mxu1 %v516_v1 }
   0xa   :  { %442 = vmatprep.mubr.msk.bf16.mxu0 %vm517_vm0, %v516_v1 }
   0xc   :  { %411 = vmatpush3.bf16.msra.mxu1 %v454_v6 }
   0xd   :  { %412 = vmatprep.subr.bf16.mxu1 %v516_v1 }
   0xe   :  { %15 = vsyncpa [#allocation5], 0  ;;  %v456_v8 = vld [vmem:[%s682_s3 + $0x20] sm:$0xff]   ;;  %v457_v9 = vld [vmem:[%s682_s3 + $0x28] sm:$0xff]   ;;  %s518_s19 = smov [#allocation4]  }
   0xf   :  { %v458_v10 = vld [vmem:[%s682_s3 + $0x30] sm:$0xff]   ;;  %v459_v11 = vld [vmem:[%s682_s3 + $0x38] sm:$0xff]   ;;  %v460_v12 = vld [vmem:[%s684_s5] sm:$0xff]   ;;  %s343_s20 = sshll.u32 %s518_s19, 4  ;;  %s344_s20 = int_to_ptr.vmem [resolvable:$true] %s343_s20 }
  0x10   :  { %413 = vmatpush3.bf16.msra.mxu1 %v455_v7  ;;  %427 = vmatpush3.bf16.msra.mxu0 %v460_v12  ;;  %v461_v13 = vld [vmem:[%s684_s5 + $0x8] sm:$0xff]   ;;  %v462_v14 = vld [vmem:[%s684_s5 + $0x10] sm:$0xff]   ;;  %v463_v15 = vld [vmem:[%s684_s5 + $0x18] sm:$0xff]   ;;  %s468_s21 = scalar_lea.vmem %s344_s20, 128  ;;  %p473_p1 = scmp.lt.s32.totalorder %s344_s20, %s344_s20 }
  0x11   :  { %414 = vmatprep.subr.bf16.mxu1 %v516_v1  ;;  %428 = vmatprep.subr.bf16.mxu0 %v516_v1  ;;  %v464_v16 = vld [vmem:[%s684_s5 + $0x20] sm:$0xff]   ;;  %v465_v17 = vld [vmem:[%s684_s5 + $0x28] sm:$0xff]   ;;  %v466_v26 = vld [vmem:[%s684_s5 + $0x30] sm:$0xff]   ;;  %p469_p0 = scmp.ne.s32.totalorder %s344_s20, %s468_s21  ;;  %p474_p2 = scmp.lt.s32.totalorder %s468_s21, %s468_s21 }
  0x12   :  { %v355_v18 = vld [vmem:[%s681_s2] ss:$0 sm:$0xff]  ;;  %v467_v27 = vld [vmem:[%s684_s5 + $0x38] sm:$0xff]  }
  0x13   :  { %v359_v28 = vld [vmem:[%s683_s4] ss:$0 sm:$0xff]  ;;  %p475_p3 = por %p474_p2, %p473_p1 }
  0x14   :  { %415 = vmatpush3.bf16.msra.mxu1 %v456_v8  ;;  %429 = vmatpush3.bf16.msra.mxu0 %v461_v13 }
  0x15   :  { %416 = vmatprep.subr.bf16.mxu1 %v516_v1  ;;  %430 = vmatprep.subr.bf16.mxu0 %v516_v1  ;;  %p476_p4 = pnand %p475_p3, %p469_p0 }
  0x18   :  { %417 = vmatpush3.bf16.msra.mxu1 %v457_v9  ;;  %431 = vmatpush3.bf16.msra.mxu0 %v462_v14 }
  0x19   :  { %418 = vmatprep.subr.bf16.mxu1 %v516_v1  ;;  %432 = vmatprep.subr.bf16.mxu0 %v516_v1 }
  0x1c   :  { %419 = vmatpush3.bf16.msra.mxu1 %v458_v10  ;;  %433 = vmatpush3.bf16.msra.mxu0 %v463_v15 }
  0x1d   :  { %420 = vmatprep.subr.bf16.mxu1 %v516_v1  ;;  %434 = vmatprep.subr.bf16.mxu0 %v516_v1 }
  0x20   :  { %421 = vmatpush3.bf16.msra.mxu1 %v459_v11  ;;  %435 = vmatpush3.bf16.msra.mxu0 %v464_v16 }
  0x21   :  { %436 = vmatprep.subr.bf16.mxu0 %v516_v1 }
  0x24   :  { %437 = vmatpush3.bf16.msra.mxu0 %v465_v17 }
  0x25   :  { %438 = vmatprep.subr.bf16.mxu0 %v516_v1 }
  0x28   :  { %439 = vmatpush3.bf16.msra.mxu0 %v466_v26 }
  0x29   :  { %440 = vmatprep.subr.bf16.mxu0 %v516_v1 }
  0x2c   :  { %441 = vmatpush3.bf16.msra.mxu0 %v467_v27 }
  0xdc   :  { %v93_v19 = vpop.f32.mrb[0].mxu0 }
  0xdd   :  { %v94_v20 = vadd.f32 %v355_v18, %v93_v19  ;;  %v404_v21 = vpop.f32.mrb[1].mxu0 }
  0xde   :  { %v96_v22 = vpop.f32.mrb[2].mxu0 }
  0xdf   :  { %v99_v23 = vmax.f32 %v94_v20, 0.0  ;;  %v405_v24 = vpop.f32.mrb[3].mxu0 }
  0xe1   :  { %v100_v25 = vpack.c.bf16 %v99_v23, %v99_v23 }
  0xe3   :  { %423 = vmatmul.mubr.bf16.vlgmr.msra.gmra.mrb[0].mxu1 %v100_v25 }
 0x1b6   :  { %v206_v29 = vpop.f32.mrb[0].mxu1 }
 0x1b7   :  { %v207_v30 = vadd.f32 %v359_v28, %v206_v29  ;;  %v424_v31 = vpop.f32.mrb[1].mxu1 }
 0x1b8   :  { %v209_v32 = vpop.f32.mrb[2].mxu1 }
 0x1b9   :  { %v212_v33 = vmax.f32 %v207_v30, 0.0  ;;  %v425_v34 = vpop.f32.mrb[3].mxu1 }
 0x1bb   :  { %v213_v35 = vpack.c.bf16 %v212_v33, %v212_v33  ;;  %326 = vst [vmem:[#allocation4] sm:$0xff] %v212_v33 }
 0x1bd   :  { %443 = vmatmul.mubr.bf16.vlgmr.msra.gmra.mrb[4].mxu0 %v213_v35 }
 0x1be   :  { %479 = shalt.err (!%p476_p4)
}
 0x1bf   :  { %s480_s22 = scalar_lea.hbm %s687_s8, 128 }
 0x1c0   :  { %p481_p5 = scmp.ne.s32.totalorder %s687_s8, %s480_s22  ;;  %p484_p6 = scmp.lt.u32.totalorder %s480_s22, %s687_s8 }
 0x1c2   :  { %p486_p7 = pnand %p484_p6, %p481_p5 }
 0x1c4   :  { %489 = shalt.err (!%p486_p7)
}
 0x1c5   :  { %346 = dma.vmem_to_hbm [thread:$0]  %s344_s20, 128, %s687_s8, [#allocation5]   ;;  %v368_v36 = vld [vmem:[%s685_s6] ss:$0 sm:$0xff] }
 0x1c6   :  { %s519_s3 = smov [#allocation2]  }
 0x1c7   :  { %s333_s9 = sshll.u32 %s519_s3, 4  ;;  %s334_s9 = int_to_ptr.vmem [resolvable:$true] %s333_s9 }
 0x1c8   :  { %s490_s10 = scalar_lea.vmem %s334_s9, 128  ;;  %p495_p9 = scmp.lt.s32.totalorder %s334_s9, %s334_s9 }
 0x1c9   :  { %p491_p8 = scmp.ne.s32.totalorder %s334_s9, %s490_s10  ;;  %p496_p10 = scmp.lt.s32.totalorder %s490_s10, %s490_s10 }
 0x1cb   :  { %p497_p11 = por %p496_p10, %p495_p9 }
 0x1cd   :  { %p498_p12 = pnand %p497_p11, %p491_p8 }
 0x290   :  { %v319_v37 = vpop.f32.mrb[4].mxu0 }
 0x291   :  { %v320_v38 = vadd.f32 %v368_v36, %v319_v37  ;;  %v444_v39 = vpop.f32.mrb[5].mxu0 }
 0x292   :  { %v322_v40 = vpop.f32.mrb[6].mxu0 }
 0x293   :  { %325 = vst [vmem:[#allocation2] sm:$0xff] %v320_v38  ;;  %v445_v41 = vpop.f32.mrb[7].mxu0 }
 0x294   :  { %501 = shalt.err (!%p498_p12)
}
 0x295   :  { %s502_s6 = scalar_lea.hbm %s686_s7, 128 }
 0x296   :  { %p503_p13 = scmp.ne.s32.totalorder %s686_s7, %s502_s6  ;;  %p506_p0 = scmp.lt.u32.totalorder %s502_s6, %s686_s7 }
 0x298   :  { %p508_p1 = pnand %p506_p0, %p503_p13 }
 0x29a   :  { %511 = shalt.err (!%p508_p1)
}
 0x29b   :  { %336 = dma.vmem_to_hbm [thread:$0]  %s334_s9, 128, %s686_s7, [#allocation3]  }
 0x29c   :  { %512 = dma.done.wait [#allocation3], 128  }
 0x29d   :  { %513 = vsyncadd [#allocation3], 4294967168 }
 0x29e   :  { %514 = dma.done.wait [#allocation5], 128  }
 0x29f   :  { %515 = vsyncadd [#allocation5], 4294967168 }
 0x2a0   :  { %353 = vsyncpa [#allocation3], 1 }
 0x2a1   :  { %354 = vsyncpa [#allocation5], 1 }

</bundles_post_ra>
